<compile_context>
chip_gen: v7x
topology: tpu7x:2x2x1
jax: 0.10.0
libtpu: 0.0.40
codegen_flags: <defaults>
</compile_context>

<pallas_src>
import functools

import jax
import jax.numpy as jnp
from jax import lax
from jax.experimental import pallas as pl
from jax.experimental.pallas import tpu as pltpu


def _cdiv(a, b):
    return -(-a // b)


def _round_up(a, b):
    return _cdiv(a, b) * b


def _embed_kernel(ids_ref, table_ref, out_ref, *, k, tile_v):
    # ids_ref  : (tile_m, k)     int32 -- k packed token ids per output row
    # table_ref: (tile_v, D)           -- current vocab tile of the table
    # out_ref  : (tile_m, k * D)       -- accumulator over the vocab grid axis
    vi = pl.program_id(1)

    @pl.when(vi == 0)
    def _():
        out_ref[...] = jnp.zeros_like(out_ref)

    tbl = table_ref[...]                                   # (tile_v, D)
    ids = ids_ref[...]                                     # (tile_m, k)
    tile_m = ids.shape[0]

    # Global vocab ids covered by this vocab tile.
    col = lax.broadcasted_iota(jnp.int32, (tile_m, tile_v), 1) + vi * tile_v

    parts = []
    for j in range(k):                                     # static unroll, k is tiny
        ids_j = ids[:, j:j + 1]                            # (tile_m, 1)
        onehot = (ids_j == col).astype(tbl.dtype)          # (tile_m, tile_v)
        parts.append(
            jnp.dot(onehot, tbl, preferred_element_type=jnp.float32)
        )                                                  # (tile_m, D)
    update = jnp.concatenate(parts, axis=-1) if k > 1 else parts[0]
    out_ref[...] += update.astype(out_ref.dtype)


def semantic_embedding(x, table, *, tile_m=128, tile_v=512):
    """Pallas equivalent of SemanticEmbeddingModel.forward.

    Args:
      x:     (..., H, W) integer token ids.
      table: (vocab_size, embed_dim) embedding weights.

    Returns:
      (..., H, W, embed_dim) features with table's dtype.
    """
    assert jnp.issubdtype(x.dtype, jnp.integer), f"x.dtype: {x.dtype}"
    vocab, embed_dim = table.shape
    orig_shape = x.shape
    itemsize = jnp.dtype(table.dtype).itemsize

    flat = x.reshape(-1).astype(jnp.int32)
    n = flat.shape[0]

    # Pack k tokens per output row so the output block is >= 128 lanes wide.
    k = 128 // embed_dim if (embed_dim < 128 and 128 % embed_dim == 0) else 1

    rows = _cdiv(n, k)
    # Cap tile_m so the parallel token axis gets >= 2 grid steps when possible
    # (v7x has 2 TensorCores; megacore shards "parallel" axes).
    tile_m_eff = min(tile_m, max(8, _round_up(_cdiv(rows, 2), 8)))
    rows_pad = _round_up(rows, tile_m_eff)
    n_pad = rows_pad * k
    if n_pad != n:
        flat = jnp.pad(flat, (0, n_pad - n))               # padded ids -> row 0, sliced off
    ids2d = flat.reshape(rows_pad, k)

    # Vocab tiling (inner, "arbitrary" reduction axis).
    tile_v_eff = min(tile_v, _round_up(vocab, 8))
    v_pad = _round_up(vocab, tile_v_eff)
    tbl = table
    if v_pad != vocab:
        tbl = jnp.pad(table, ((0, v_pad - vocab), (0, 0)))  # zero rows, never selected

    grid = (rows_pad // tile_m_eff, v_pad // tile_v_eff)

    # Explicit VMEM budget: double-buffered ids/table/out blocks + headroom.
    block_bytes = (
        tile_m_eff * k * 4
        + tile_v_eff * embed_dim * itemsize
        + tile_m_eff * k * embed_dim * itemsize
    )
    vmem_limit = int(min(64 << 20, 4 * block_bytes + (4 << 20)))

    kernel = functools.partial(_embed_kernel, k=k, tile_v=tile_v_eff)

    out = pl.pallas_call(
        kernel,
        out_shape=jax.ShapeDtypeStruct((rows_pad, k * embed_dim), table.dtype),
        grid_spec=pltpu.PrefetchScalarGridSpec(
            num_scalar_prefetch=0,
            grid=grid,
            in_specs=[
                pl.BlockSpec((tile_m_eff, k), lambda i, vi: (i, 0)),          # packed ids
                pl.BlockSpec((tile_v_eff, embed_dim), lambda i, vi: (vi, 0)),  # vocab tile
            ],
            out_specs=pl.BlockSpec((tile_m_eff, k * embed_dim), lambda i, vi: (i, 0)),
        ),
        compiler_params=pltpu.CompilerParams(
            dimension_semantics=("parallel", "arbitrary"),
            vmem_limit_bytes=vmem_limit,
        ),
    )(ids2d, tbl)

    out = out.reshape(rows_pad * k, embed_dim)[:n]
    return out.reshape(*orig_shape, embed_dim)


def init_params(vocab_size, embed_dim, key):
    # matches nn.Embedding init: normal(mean=0, std=0.02)
    return jax.random.normal(key, (vocab_size, embed_dim), jnp.float32) * 0.02


if __name__ == "__main__":
    vocab_size = 64
    embed_dim = 32
    batch, H, W = 2, 8, 8

    key = jax.random.PRNGKey(0)
    k_tab, k_tok = jax.random.split(key)

    table = init_params(vocab_size, embed_dim, k_tab)
    x = jax.random.randint(k_tok, (batch, H, W), 0, vocab_size, dtype=jnp.int32)

    y = semantic_embedding(x, table)
    y = jax.block_until_ready(y)

    # Reference check against plain JAX gather.
    ref = table[x]
    assert y.shape == (batch, H, W, embed_dim), y.shape
    assert jnp.allclose(y, ref, atol=1e-6), "mismatch vs reference gather"

    print("KERNEL_OK")
</pallas_src>

<mosaic_0001>
module attributes {stable_mosaic.version = 11 : i64} {
  func.func @_embed_kernel(%arg0: i32, %arg1: i32, %arg2: memref<16x4xi32, #tpu.memory_space<vmem>>, %arg3: memref<64x32xf32, #tpu.memory_space<vmem>>, %arg4: memref<16x128xf32, #tpu.memory_space<vmem>>) attributes {dimension_semantics = [#tpu.dimension_semantics<parallel>, #tpu.dimension_semantics<arbitrary>], iteration_bounds = array<i64: 2, 1>, scalar_prefetch = 0 : i64, scratch_operands = 0 : i64, tpu.core_type = #tpu.core_type<tc>, window_params = [{transform_indices = @transform_0, window_bounds = array<i64: 16, 4>}, {transform_indices = @transform_1, window_bounds = array<i64: 64, 32>}, {transform_indices = @transform_2, window_bounds = array<i64: 16, 128>}]} {
    %c0_i32 = arith.constant 0 : i32
    %0 = arith.cmpi eq, %arg1, %c0_i32 : i32
    %1 = arith.extui %0 : i1 to i32
    %c0_i32_0 = arith.constant 0 : i32
    %2 = arith.cmpi ne, %1, %c0_i32_0 : i32
    scf.if %2 {
      %cst_11 = arith.constant 0.000000e+00 : f32
      %37 = vector.broadcast %cst_11 : f32 to vector<16x128xf32>
      %c0_12 = arith.constant 0 : index
      %c0_13 = arith.constant 0 : index
      %38 = vector.load %arg4[%c0_12, %c0_13] : memref<16x128xf32, #tpu.memory_space<vmem>>, vector<16x128xf32>
      tpu.vector_store %arg4[%c0_12, %c0_13], %37 {strides = array<i32>} : memref<16x128xf32, #tpu.memory_space<vmem>>, vector<16x128xf32>,
    } else {
    }
    %c0 = arith.constant 0 : index
    %c0_1 = arith.constant 0 : index
    %3 = vector.load %arg3[%c0, %c0_1] : memref<64x32xf32, #tpu.memory_space<vmem>>, vector<64x32xf32>
    %c0_2 = arith.constant 0 : index
    %c0_3 = arith.constant 0 : index
    %4 = vector.load %arg2[%c0_2, %c0_3] : memref<16x4xi32, #tpu.memory_space<vmem>>, vector<16x4xi32>
    %5 = tpu.iota {dimensions = array<i32: 1>} : vector<16x64xi32>
    %c64_i32 = arith.constant 64 : i32
    %6 = arith.muli %arg1, %c64_i32 : i32
    %7 = vector.broadcast %6 : i32 to vector<16x64xi32>
    %8 = arith.addi %5, %7 : vector<16x64xi32>
    %9 = vector.extract_strided_slice %4 {offsets = [0, 0], sizes = [16, 1], strides = [1, 1]} : vector<16x4xi32> to vector<16x1xi32>
    %10 = vector.broadcast %9 : vector<16x1xi32> to vector<16x64xi32>
    %11 = arith.cmpi eq, %10, %8 : vector<16x64xi32>
    %12 = arith.extui %11 : vector<16x64xi1> to vector<16x64xi32>
    %13 = arith.sitofp %12 : vector<16x64xi32> to vector<16x64xf32>
    %cst = arith.constant dense<0.000000e+00> : vector<16x32xf32>
    %14 = tpu.matmul %13, %3, %cst {dimension_numbers = #tpu.dot_dimension_numbers<[1], [0], [0], [1], [0, 0, 1, 1], [], []>} : vector<16x64xf32>, vector<64x32xf32>, vector<16x32xf32> -> vector<16x32xf32>
    %15 = vector.extract_strided_slice %4 {offsets = [0, 1], sizes = [16, 1], strides = [1, 1]} : vector<16x4xi32> to vector<16x1xi32>
    %16 = vector.broadcast %15 : vector<16x1xi32> to vector<16x64xi32>
    %17 = arith.cmpi eq, %16, %8 : vector<16x64xi32>
    %18 = arith.extui %17 : vector<16x64xi1> to vector<16x64xi32>
    %19 = arith.sitofp %18 : vector<16x64xi32> to vector<16x64xf32>
    %cst_4 = arith.constant dense<0.000000e+00> : vector<16x32xf32>
    %20 = tpu.matmul %19, %3, %cst_4 {dimension_numbers = #tpu.dot_dimension_numbers<[1], [0], [0], [1], [0, 0, 1, 1], [], []>} : vector<16x64xf32>, vector<64x32xf32>, vector<16x32xf32> -> vector<16x32xf32>
    %21 = vector.extract_strided_slice %4 {offsets = [0, 2], sizes = [16, 1], strides = [1, 1]} : vector<16x4xi32> to vector<16x1xi32>
    %22 = vector.broadcast %21 : vector<16x1xi32> to vector<16x64xi32>
    %23 = arith.cmpi eq, %22, %8 : vector<16x64xi32>
    %24 = arith.extui %23 : vector<16x64xi1> to vector<16x64xi32>
    %25 = arith.sitofp %24 : vector<16x64xi32> to vector<16x64xf32>
    %cst_5 = arith.constant dense<0.000000e+00> : vector<16x32xf32>
    %26 = tpu.matmul %25, %3, %cst_5 {dimension_numbers = #tpu.dot_dimension_numbers<[1], [0], [0], [1], [0, 0, 1, 1], [], []>} : vector<16x64xf32>, vector<64x32xf32>, vector<16x32xf32> -> vector<16x32xf32>
    %27 = vector.extract_strided_slice %4 {offsets = [0, 3], sizes = [16, 1], strides = [1, 1]} : vector<16x4xi32> to vector<16x1xi32>
    %28 = vector.broadcast %27 : vector<16x1xi32> to vector<16x64xi32>
    %29 = arith.cmpi eq, %28, %8 : vector<16x64xi32>
    %30 = arith.extui %29 : vector<16x64xi1> to vector<16x64xi32>
    %31 = arith.sitofp %30 : vector<16x64xi32> to vector<16x64xf32>
    %cst_6 = arith.constant dense<0.000000e+00> : vector<16x32xf32>
    %32 = tpu.matmul %31, %3, %cst_6 {dimension_numbers = #tpu.dot_dimension_numbers<[1], [0], [0], [1], [0, 0, 1, 1], [], []>} : vector<16x64xf32>, vector<64x32xf32>, vector<16x32xf32> -> vector<16x32xf32>
    %33 = tpu.concatenate %14, %20, %26, %32 in 1 : vector<16x32xf32>, vector<16x32xf32>, vector<16x32xf32>, vector<16x32xf32> -> vector<16x128xf32>
    %c0_7 = arith.constant 0 : index
    %c0_8 = arith.constant 0 : index
    %34 = vector.load %arg4[%c0_7, %c0_8] : memref<16x128xf32, #tpu.memory_space<vmem>>, vector<16x128xf32>
    %35 = arith.addf %34, %33 : vector<16x128xf32>
    %c0_9 = arith.constant 0 : index
    %c0_10 = arith.constant 0 : index
    %36 = vector.load %arg4[%c0_9, %c0_10] : memref<16x128xf32, #tpu.memory_space<vmem>>, vector<16x128xf32>
    tpu.vector_store %arg4[%c0_9, %c0_10], %35 {strides = array<i32>} : memref<16x128xf32, #tpu.memory_space<vmem>>, vector<16x128xf32>,
    return
  }
  func.func @transform_0(%arg0: i32, %arg1: i32) -> (i32, i32) {
    %c0_i32 = arith.constant 0 : i32
    %c0_i32_0 = arith.constant 0 : i32
    return %arg0, %c0_i32 : i32, i32
  }
  func.func @transform_1(%arg0: i32, %arg1: i32) -> (i32, i32) {
    %c0_i32 = arith.constant 0 : i32
    %c0_i32_0 = arith.constant 0 : i32
    return %arg1, %c0_i32 : i32, i32
  }
  func.func @transform_2(%arg0: i32, %arg1: i32) -> (i32, i32) {
    %c0_i32 = arith.constant 0 : i32
    %c0_i32_0 = arith.constant 0 : i32
    return %arg0, %c0_i32 : i32, i32
  }
}

</mosaic_0001>

<bundles_post_ra>
// kernel: tpu_custom_call.1
= control target key start
LH: loop header
LB: loop body
LE: loop exit
PB: predicated region body
PF: predicated region fallthrough
CT: control target
= control target key end

     0   :  { %7 = vsyncpa [#allocation3], 0  ;;  %s1286_s0 = inlined_call_operand.vmem [shape: s32[32,4], index: 0, kind: input, shape index: {}]   ;;  %s1287_s1 = inlined_call_operand.vmem [shape: f32[64,32], index: 1, kind: input, shape index: {}]   ;;  %s1288_s2 = inlined_call_operand.hbm [shape: f32[32,128], index: 2, kind: output, shape index: {}]  }
   0x1   :  { %9 = vsyncpa [#allocation3 + $0x1], 0  ;;  %s1098_s9 = smov 0   ;;  %s1100_s10 = smov 0  }
   0x2   :  { %s1102_s11 = smov 0   ;;  %s1104_s12 = smov 0  }
   0x3   :  { %s1106_s13 = smov 0   ;;  %s1108_s14 = smov 0  }
   0x4 LB: > { %s710_s15 = sadd.s32 4294967295, %s1070_s14   ;;  %s711_s16 = sadd.s32 4294967294, %s1070_s14   ;;  %s1070_s14 = sphi %s1108_s14, %s15_s14   ;;  %s1066_s13 = sphi %s1106_s13, %s1295_s13   ;;  %s1062_s12 = sphi %s1104_s12, %s1294_s12   ;;  %s1058_s11 = sphi %s1102_s11, %s1293_s11   ;;  %s1054_s10 = sphi %s1100_s10, %s1292_s10   ;;  %s1050_s9 = sphi %s1098_s9, %s1291_s9  }
   0x5   : > { %s27_s17 = sadd.s32 1, %s1066_s13  ;;  %s86_s18 = sadd.s32 1, %s1058_s11 }
   0x6   : > { %p29_p0 = scmp.ge.s32.totalorder %s27_s17, 2  ;;  %p96_p1 = scmp.ne.s32.totalorder %s1058_s11, %s1054_s10 }
   0x7   : > { %p97_p2 = scmp.eq.s32.totalorder %s710_s15, 1  ;;  %p102_p3 = scmp.ne.s32.totalorder %s1054_s10, %s1050_s9 }
   0x8   : > { %s1297_s17 = smov (%p29_p0, %s27_s17), 0  ;;  %p103_p5 = scmp.eq.s32.totalorder %s711_s16, 1 }
   0x9   : > { %p1138_p4 = por %p97_p2, %p96_p1  ;;  %s83_s20 = ssub.s32 %s1066_s13, %s1297_s17 }
   0xa   : > { %p715_p6 = scmp.ge.s32.totalorder %s1070_s14, 1  ;;  %p84_p7 = scmp.eq.s32.totalorder %s83_s20, 0 }
   0xb   : > { %p1145_p8 = por %p103_p5, %p102_p3  ;;  %p139_p9 = scmp.lt.s32.totalorder %s1070_s14, 3 }
   0xc   : > { %s1151_s22 = scalar_select %p84_p7, %s1058_s11, %s86_s18  }
   0xd   : > { %p140_p10 = pnand %p715_p6, %p139_p9 }
   0xe   : > { %s717_s23 = sshll.u32 (!%p140_p10), %s1062_s12, 1  ;;  %v185_v0 = vld [vmem:[%s1287_s1] sm:$0xff] (!%p140_p10)  ;;  %v1072_v1 = vmov (!%p140_p10), 1   ;;  %v1073_v2 = vmov (!%p140_p10), 0   ;;  %v186_v3 = vld [vmem:[%s1287_s1 + $0x8] sm:$0xff] (!%p140_p10)  ;;  %v187_v4 = vld [vmem:[%s1287_s1 + $0x10] sm:$0xff] (!%p140_p10)  ;;  %v195_v18 = vlaneseq (!%p140_p10) }
   0xf   : > { %143 = sbr.rel (%p140_p10) target bundleno = 524 (0x20c), region = 28  ;;  %987 = vset.pattern.permute.xlu1 (!%p140_p10), %v1072_v1  ;;  %986 = vset.pattern.permute.xlu0 (!%p140_p10), %v1073_v2  ;;  %p167_p11 = scmp.lt.s32.totalorder (!%p140_p10), %s717_s23, 3  ;;  %v188_v5 = vld [vmem:[%s1287_s1 + $0x18] sm:$0xff] (!%p140_p10)  ;;  %v1166_v6 = vpack.c.bf16 (!%p140_p10), %v186_v3, %v185_v0  ;;  %v189_v8 = vld [vmem:[%s1287_s1 + $0x20] sm:$0xff] (!%p140_p10)  ;;  %v190_v9 = vld [vmem:[%s1287_s1 + $0x28] sm:$0xff] (!%p140_p10)  ;;  %v1074_v16 = vmov (!%p140_p10), 2  }
  0x10   : > { %v1168_v7 = vpack.c.bf16 (!%p140_p10), %v188_v5, %v187_v4  ;;  %v1185_v10 = vpack.c.bf16 (!%p140_p10), %v190_v9, %v189_v8  ;;  %v191_v12 = vld [vmem:[%s1287_s1 + $0x30] sm:$0xff] (!%p140_p10)  ;;  %v192_v13 = vld [vmem:[%s1287_s1 + $0x38] sm:$0xff] (!%p140_p10)  ;;  %v1075_v17 = vmov (!%p140_p10), 3   ;;  %v196_v19 = vand.u32 (!%p140_p10), 127, %v195_v18  ;;  %s1077_s26 = smov (!%p140_p10), 32   ;;  %s1078_s27 = smov (!%p140_p10), 64  }
  0x11   : > { %858 = vmatprep.subr.bf16.mxu0 (!%p140_p10), %v1166_v6  ;;  %874 = vmatprep.subr.bf16.mxu1 (!%p140_p10), %v1166_v6  ;;  %v1197_v15 = vpack.c.bf16 (!%p140_p10), %v192_v13, %v191_v12  ;;  %vm212_vm0 = vcmask (!%p140_p10), 523264   ;;  %v1076_v22 = vmov (!%p140_p10), 0.0   ;;  %s1079_s28 = smov (!%p140_p10), 96   ;;  %s163_s29 = sand.u32 (!%p140_p10), 1, %s1054_s10   ;;  %vm597_vm9 = vcmask (!%p140_p10), 261120  }
  0x12   : > { %860 = vmatpush3.bf16.msra.mxu0 (!%p140_p10), %v1166_v6  ;;  %876 = vmatpush3.bf16.msra.mxu1 (!%p140_p10), %v1166_v6  ;;  %s716_s30 = sshll.u32 (!%p140_p10), %s163_s29, 4  ;;  %vm602_vm10 = vcmask (!%p140_p10), 785408   ;;  %s740_s3 = sshll.u32 (!%p140_p10), %s1062_s12, 8 }
  0x13   : > { %862 = vmatprep.subr.bf16.mxu0 (!%p140_p10), %v1168_v7  ;;  %878 = vmatprep.subr.bf16.mxu1 (!%p140_p10), %v1168_v7  ;;  %s165_s4 = scalar_lea.vmem (!%p140_p10), [#allocation2], %s716_s30  ;;  %s1240_s12 = scalar_lea.sflag (!%p140_p10), [#allocation3], %s163_s29 }
  0x14   : > { %s625_s5 = sshll.u32 (!%p140_p10), %s165_s4, 4  ;;  %s1080_s16 = smov (!%p140_p10), [#allocation2]   ;;  %s1238_s5 = int_to_ptr.vmem [resolvable:$true] %s625_s5 }
  0x15   : > { %s992_s15 = scalar_lea.vmem (!%p140_p10), %s1238_s5, 256 }
  0x16   : > { %s1299_s23 = smov (!%p167_p11, %s717_s23), 3  ;;  %864 = vmatpush3.bf16.msra.mxu0 %v1168_v7  ;;  %880 = vmatpush3.bf16.msra.mxu1 %v1168_v7  ;;  %p993_p12 = scmp.ne.s32.totalorder %s1238_s5, %s992_s15 }
  0x17   : > { %s718_s8 = sshll.u32 %s1299_s23, 3  ;;  %866 = vmatprep.subr.bf16.mxu0 %v1185_v10  ;;  %882 = vmatprep.subr.bf16.mxu1 %v1185_v10 }
  0x18   : > { %s170_s18 = scalar_lea.vmem %s1286_s0, %s718_s8  ;;  %s1236_s8 = scalar_lea.hbm %s1288_s2, %s740_s3 }
  0x19   : > { %v193_v11 = vld [vmem:[%s170_s18] sm:$0xff]  ;;  %v194_v14 = vld [vmem:[%s170_s18 + $0x8] sm:$0xff]  ;;  %p994_p13 = pnand %p993_p12, %p1138_p4  ;;  %s996_s18 = sshll.u32 %s1080_s16, 4  ;;  %s997_s18 = int_to_ptr.vmem [resolvable:$false] %s996_s18 }
  0x1a   : > { %295 = vperm.xlu1 %987, %v193_v11   ;;  %201 = vperm.xlu0 %986, %v193_v11   ;;  %s998_s20 = scalar_lea.vmem %s997_s18, 512  ;;  %p999_p1 = scmp.lt.s32.totalorder %s1238_s5, %s997_s18 }
  0x1b   : > { %868 = vmatpush3.bf16.msra.mxu0 %v1185_v10  ;;  %884 = vmatpush3.bf16.msra.mxu1 %v1185_v10  ;;  %p995_p0 = pneg %p994_p13  ;;  %p1000_p2 = scmp.lt.s32.totalorder %s998_s20, %s992_s15 }
  0x1c   : > { %870 = vmatprep.subr.bf16.mxu0 %v1197_v15  ;;  %886 = vmatprep.subr.bf16.mxu1 %v1197_v15 }
  0x1d   : > { %p1001_p3 = por %p1000_p2, %p999_p1 }
  0x1e   : > { %298 = vperm.xlu1 %987, %v194_v14   ;;  %204 = vperm.xlu0 %986, %v194_v14  }
  0x1f   : > { %872 = vmatpush3.bf16.msra.mxu0 %v1197_v15  ;;  %888 = vmatpush3.bf16.msra.mxu1 %v1197_v15  ;;  %p1002_p5 = pnand %p1001_p3, %p995_p0 }
  0x20   : > { %890 = vmatprep.subr.bf16.mxu0 %v1166_v6  ;;  %906 = vmatprep.subr.bf16.mxu1 %v1166_v6 }
  0x22   : > { %989 = vset.pattern.permute.xlu1 %v1074_v16  ;;  %988 = vset.pattern.permute.xlu0 %v1074_v16 }
  0x23   : > { %391 = vperm.xlu1 %989, %v194_v14   ;;  %388 = vperm.xlu0 %988, %v193_v11  }
  0x27   : > { %990 = vset.pattern.permute.xlu1 %v1075_v17  ;;  %991 = vset.pattern.permute.xlu0 %v1075_v17 }
  0x28   : > { %481 = vperm.xlu1 %990, %v193_v11   ;;  %484 = vperm.xlu0 %991, %v194_v14  }
  0x99   : > { %v296_v20 = vpop.permute.xlu1 %295  ;;  %v202_v21 = vpop.permute.xlu0 %201 }
  0x9a   : > { %vm300_vm1 = vcmp.eq.s32.totalorder %v296_v20, %v196_v19  ;;  %vm206_vm2 = vcmp.eq.s32.totalorder %v202_v21, %v196_v19 }
  0x9b   : > { %v719_v23 = vsel %vm206_vm2, 1.0, %v1076_v22  ;;  %v723_v24 = vsel %vm300_vm1, 1.0, %v1076_v22 }
  0x9c   : > { %797 = vmatprep.mubr.msk.f32.mxu0 %vm212_vm0, %v719_v23  ;;  %816 = vmatprep.mubr.msk.f32.mxu1 %vm212_vm0, %v723_v24 }
  0x9d   : > { %v299_v25 = vpop.permute.xlu1 %298  ;;  %v205_v26 = vpop.permute.xlu0 %204 }
  0x9e   : > { %vm301_vm3 = vcmp.eq.s32.totalorder %v299_v25, %v196_v19  ;;  %vm207_vm4 = vcmp.eq.s32.totalorder %v205_v26, %v196_v19 }
  0x9f   : > { %v724_v27 = vsel %vm301_vm3, 1.0, %v1076_v22  ;;  %v720_v28 = vsel %vm207_vm4, 1.0, %v1076_v22 }
  0xa0   : > { %798 = vmatmul.mubr.msk.f32.vlgmr.msra.gmra.mrb[0].mxu0 %vm212_vm0, %v720_v28  ;;  %817 = vmatmul.mubr.msk.f32.vlgmr.msra.gmra.mrb[0].mxu1 %vm212_vm0, %v724_v27 }
  0xa1   : > { %892 = vmatpush3.bf16.msra.mxu0 %v1166_v6  ;;  %908 = vmatpush3.bf16.msra.mxu1 %v1166_v6 }
  0xa2   : > { %894 = vmatprep.subr.bf16.mxu0 %v1168_v7  ;;  %910 = vmatprep.subr.bf16.mxu1 %v1168_v7  ;;  %v392_v29 = vpop.permute.xlu1 %391  ;;  %v389_v30 = vpop.permute.xlu0 %388 }
  0xa3   : > { %vm393_vm5 = vcmp.eq.s32.totalorder %v389_v30, %v196_v19  ;;  %vm394_vm8 = vcmp.eq.s32.totalorder %v392_v29, %v196_v19 }
  0xa4   : > { %v727_v31 = vsel %vm393_vm5, 1.0, %v1076_v22  ;;  %v728_v36 = vsel %vm394_vm8, 1.0, %v1076_v22 }
  0xa5   : > { %896 = vmatpush3.bf16.msra.mxu0 %v1168_v7  ;;  %912 = vmatpush3.bf16.msra.mxu1 %v1168_v7 }
  0xa6   : > { %898 = vmatprep.subr.bf16.mxu0 %v1185_v10  ;;  %914 = vmatprep.subr.bf16.mxu1 %v1185_v10 }
  0xa7   : > { %v482_v32 = vpop.permute.xlu1 %481  ;;  %835 = vmatprep.mubr.msk.f32.mxu0 %vm212_vm0, %v727_v31  ;;  %v485_v33 = vpop.permute.xlu0 %484 }
  0xa8   : > { %vm486_vm6 = vcmp.eq.s32.totalorder %v482_v32, %v196_v19  ;;  %vm487_vm7 = vcmp.eq.s32.totalorder %v485_v33, %v196_v19 }
  0xa9   : > { %900 = vmatpush3.bf16.msra.mxu0 %v1185_v10  ;;  %916 = vmatpush3.bf16.msra.mxu1 %v1185_v10  ;;  %v731_v34 = vsel %vm486_vm6, 1.0, %v1076_v22  ;;  %v732_v35 = vsel %vm487_vm7, 1.0, %v1076_v22 }
  0xaa   : > { %902 = vmatprep.subr.bf16.mxu0 %v1197_v15  ;;  %918 = vmatprep.subr.bf16.mxu1 %v1197_v15 }
  0xab   : > { %854 = vmatprep.mubr.msk.f32.mxu1 %vm212_vm0, %v731_v34 }
  0xad   : > { %904 = vmatpush3.bf16.msra.mxu0 %v1197_v15  ;;  %920 = vmatpush3.bf16.msra.mxu1 %v1197_v15 }
  0xb0   : > { %836 = vmatmul.mubr.msk.f32.vlgmr.msra.gmra.mrb[2].mxu0 %vm212_vm0, %v728_v36  ;;  %855 = vmatmul.mubr.msk.f32.vlgmr.msra.gmra.mrb[2].mxu1 %vm212_vm0, %v732_v35 }
 0x173   : > { %v799_v37 = vpop.f32.mrb[0].mxu0  ;;  %v818_v38 = vpop.f32.mrb[0].mxu1 }
 0x174   : > { %577 = vrot.lane.b32.xlu1 %v818_v38, %s1077_s26  ;;  %v285_v39 = vpop.f32.mrb[1].mxu0  ;;  %v378_v40 = vpop.f32.mrb[1].mxu1 }
 0x178   : > { %575 = vrot.lane.b32.xlu1 %v378_v40, %s1077_s26 }
 0x183   : > { %v837_v41 = vpop.f32.mrb[2].mxu0  ;;  %v856_v42 = vpop.f32.mrb[2].mxu1 }
 0x184   : > { %585 = vrot.lane.b32.xlu1 %v837_v41, %s1078_s27  ;;  %v471_v43 = vpop.f32.mrb[3].mxu0  ;;  %v564_v44 = vpop.f32.mrb[3].mxu1 }
 0x185   : > { %583 = vrot.lane.b32.xlu0 %v471_v43, %s1078_s27 }
 0x188   : > { %593 = vrot.lane.b32.xlu1 %v856_v42, %s1079_s28 }
 0x189   : > { %591 = vrot.lane.b32.xlu0 %v564_v44, %s1079_s28 }
 0x1e6   : > { %v578_v45 = vpop.permute.xlu1 %577 }
 0x1e7   : > { %v599_v49 = vsel %vm597_vm9, %v799_v37, %v578_v45 }
 0x1ea   : > { %v576_v46 = vpop.permute.xlu1 %575 }
 0x1eb   : > { %v598_v50 = vsel %vm597_vm9, %v285_v39, %v576_v46 }
 0x1f6   : > { %v586_v47 = vpop.permute.xlu1 %585 }
 0x1f7   : > { %v584_v48 = vpop.permute.xlu0 %583  ;;  %v601_v51 = vsel %vm212_vm0, %v599_v49, %v586_v47 }
 0x1f8   : > { %v600_v53 = vsel %vm212_vm0, %v598_v50, %v584_v48 }
 0x1fa   : > { %v594_v52 = vpop.permute.xlu1 %593 }
 0x1fb   : > { %v604_v54 = vsel %vm602_vm10, %v601_v51, %v594_v52  ;;  %v592_v55 = vpop.permute.xlu0 %591 }
 0x1fc   : > { %v603_v56 = vsel %vm602_vm10, %v600_v53, %v592_v55  ;;  %610 = vst [vmem:[%s165_s4 + $0x8] sm:$0xff] %v604_v54 }
 0x1fd   : > { %609 = vst [vmem:[%s165_s4] sm:$0xff] %v603_v56 }
 0x1fe   : > { %1005 = shalt.err (!%p1002_p5)
}
 0x1ff   : > { %s1006_s24 = scalar_lea.hbm %s1236_s8, 256  ;;  %s1010_s26 = scalar_lea.hbm %s1288_s2, 512 }
 0x200   : > { %p1007_p6 = scmp.ne.s32.totalorder %s1236_s8, %s1006_s24  ;;  %p1011_p10 = scmp.lt.u32.totalorder %s1236_s8, %s1288_s2 }
 0x201   : > { %p1012_p11 = scmp.lt.u32.totalorder %s1010_s26, %s1006_s24  ;;  %p1014_p13 = scmp.lt.u32.totalorder %s1006_s24, %s1236_s8 }
 0x202   : > { %p1008_p7 = pnand %p1007_p6, %p1138_p4 }
 0x203   : > { %p1013_p12 = por %p1012_p11, %p1011_p10 }
 0x204   : > { %p1009_p9 = pneg %p1008_p7 }
 0x205   : > { %p1015_p0 = por %p1014_p13, %p1013_p12 }
 0x207   : > { %p1016_p1 = pnand %p1015_p0, %p1009_p9 }
 0x209   : > { %1019 = shalt.err (!%p1016_p1)
}
 0x20a   : > { %s1081_s29 = smov 128   ;;  %s1082_s30 = smov 8  }
 0x20b   : > { %921 = dma.vmem_to_hbm [thread:$0]  (%p1138_p4), %s1238_s5, 256, %s1236_s8, %s1240_s12, %s1081_s29, %s1081_s29, %s1082_s30  }
 0x20c PF: > { %p927_p2 = scmp.ge.s32.totalorder %s1070_s14, 2  ;;  %s640_s3 = sand.u32 1, %s1050_s9  }
 0x20d   : > { %s641_s4 = scalar_lea.sflag [#allocation3], %s640_s3 }
 0x20e   : > { %p924_p3 = pnand %p927_p2, %p1145_p8 }
 0x210   : > { %1045 = dma.done.wait (!%p924_p3), %s641_s4, 256  }
 0x211   : > { %1047 = vsyncadd (!%p924_p3), %s641_s4, 4294967040  ;;  %s15_s14 = sadd.s32 1, %s1070_s14   ;;  %s1291_s9 = smov %s1054_s10 }
 0x212   : > { %p12_p5 = scmp.ge.s32.totalorder %s15_s14, 4   ;;  %s1292_s10 = smov %s1058_s11 }
 0x213   : > { %s1293_s11 = smov %s1151_s22  ;;  %s1294_s12 = smov %s1066_s13 }
 0x214   : > { %s1295_s13 = smov %s1297_s17  ;;  %14 = sbr.rel (!%p12_p5) target bundleno = 4 (0x4), region = 70 }
 0x21b   :  { %646 = vsyncpa [#allocation3], 1 }
 0x21c   :  { %648 = vsyncpa [#allocation3 + $0x1], 1 }

</bundles_post_ra>
